<compile_context>
chip_gen: v7x
topology: tpu7x:2x2x1
jax: 0.10.0
libtpu: 0.0.40
codegen_flags: <defaults>
</compile_context>

<pallas_src>
import math
from functools import partial

import jax
import jax.numpy as jnp
from jax.experimental import pallas as pl
from jax.experimental.pallas import tpu as pltpu

LANE = 128


def _round_up(v, m):
    return (v + m - 1) // m * m


def _pad2(a, pad_rows, pad_cols):
    """Zero-pad a 2-D array on the high side; no-op (no XLA op) if unneeded."""
    if pad_rows == 0 and pad_cols == 0:
        return a
    return jnp.pad(a, ((0, pad_rows), (0, pad_cols)))


def _mlp_kernel(x_ref, w1_ref, b1_ref, w2_ref, b2_ref, o_ref, acc_ref,
                *, approximate_gelu):
    """Grid = (row tiles, H slabs).  One (tm, th) slab of the MLP per step.

    x_ref:  (tm, C_in)   -- constant across the H axis (fetched once per row tile)
    w1_ref: (C_in, th)   -- streamed fc1 weight slab
    b1_ref: (1, th)      -- streamed fc1 bias slab
    w2_ref: (th, C_out)  -- streamed fc2 weight slab
    b2_ref: (1, C_out)   -- constant, single-buffered
    o_ref:  (tm, C_out)
    acc_ref:(tm, C_out) f32 accumulator scratch
    """
    k = pl.program_id(1)

    @pl.when(k == 0)
    def _():
        acc_ref[...] = jnp.zeros_like(acc_ref)

    # fc1 slab on the MXU: native-dtype operands (bf16 -> full-rate MXU path),
    # f32 accumulation via preferred_element_type.
    h = jnp.dot(x_ref[...], w1_ref[...], preferred_element_type=jnp.float32)
    h = h + b1_ref[...].astype(jnp.float32)

    # GELU with the cast to the fc2 weight dtype fused into the same epilogue
    # expression (no separate full-tile astype pass).
    if approximate_gelu:
        # tanh/exp route to the EUP -- its own VLIW slot, cheap under the MXU.
        g = jax.nn.gelu(h, approximate=True).astype(w2_ref.dtype)
    else:
        # Exact erf form matches nn.GELU()'s default numerics.
        g = (0.5 * h * (1.0 + jax.lax.erf(h * (1.0 / math.sqrt(2.0))))
             ).astype(w2_ref.dtype)

    # fc2 slab: accumulate the partial product over the H grid axis.
    acc_ref[...] += jnp.dot(g, w2_ref[...], preferred_element_type=jnp.float32)

    @pl.when(k == pl.num_programs(1) - 1)
    def _():
        o_ref[...] = (acc_ref[...] + b2_ref[...].astype(jnp.float32)
                      ).astype(o_ref.dtype)


@partial(jax.jit, static_argnames=("tm", "th", "approximate_gelu", "bf16_operands"))
def mlp_pallas(x, w1, b1, w2, b2, *, tm=512, th=512,
               approximate_gelu=False, bf16_operands=False):
    """x: (B, N, C_in), w1: (C_in, H), b1: (H,), w2: (H, C_out), b2: (C_out,).

    tm: row (token) tile, multiple of 128. 512 default (sweep 512/1024 on v6e).
    th: hidden (H) slab width, multiple of 128.
    approximate_gelu: route GELU through tanh/exp (EUP) instead of exact erf.
    bf16_operands: cast x/W1/W2 to bf16 for the MXU (f32 accumulation kept) --
        the main win on v5e when parameters arrive as f32.
    Zero padding of channels / H / rows is mathematically exact: GELU(0) == 0
    and padded weight rows/cols are zero, so padded lanes contribute nothing
    and padded rows are sliced off before returning.
    """
    assert tm % LANE == 0 and th % LANE == 0, "tm and th must be multiples of 128"

    B, N, C_in = x.shape
    H = w1.shape[1]
    C_out = w2.shape[1]
    M = B * N

    out_dtype = x.dtype
    if bf16_operands:
        x = x.astype(jnp.bfloat16)
        w1 = w1.astype(jnp.bfloat16)
        w2 = w2.astype(jnp.bfloat16)

    # Lane-dense channel padding.
    C_in_p = _round_up(C_in, LANE)
    C_out_p = _round_up(C_out, LANE)

    # H padding: to a lane multiple, then to a multiple of the H slab width.
    H_l = _round_up(H, LANE)
    th_eff = min(th, H_l)
    H_p = _round_up(H_l, th_eff)

    # Row tile: shrink for tiny inputs; keep >= 2 row steps whenever possible
    # so the 'parallel' row axis can shard across both v7x TensorCores.
    m_min = _round_up(M, LANE)
    tm_eff = min(tm, m_min)
    if m_min >= 2 * LANE and m_min // tm_eff < 2:
        tm_eff = max(LANE, _round_up(m_min // 2, LANE))
    M_p = _round_up(M, tm_eff)

    # Padding is skipped entirely when already aligned (e.g. Swin C=768, H=3072).
    x2 = _pad2(x.reshape(M, C_in), M_p - M, C_in_p - C_in)
    w1_p = _pad2(w1, C_in_p - C_in, H_p - H)
    b1_p = _pad2(b1.reshape(1, H), 0, H_p - H)
    w2_p = _pad2(w2, H_p - H, C_out_p - C_out)
    b2_p = _pad2(b2.reshape(1, C_out), 0, C_out_p - C_out)

    grid = (M_p // tm_eff, H_p // th_eff)

    out2 = pl.pallas_call(
        partial(_mlp_kernel, approximate_gelu=approximate_gelu),
        out_shape=jax.ShapeDtypeStruct((M_p, C_out_p), out_dtype),
        grid_spec=pltpu.PrefetchScalarGridSpec(
            num_scalar_prefetch=0,
            grid=grid,
            in_specs=[
                # tokens: tiled over rows, constant across the H axis
                pl.BlockSpec((tm_eff, C_in_p), lambda i, k: (i, 0)),
                # fc1 weight / bias: streamed H slabs (double-buffered DMA)
                pl.BlockSpec((C_in_p, th_eff), lambda i, k: (0, k)),
                pl.BlockSpec((1, th_eff), lambda i, k: (0, k)),
                # fc2 weight: streamed H slabs
                pl.BlockSpec((th_eff, C_out_p), lambda i, k: (k, 0)),
                # fc2 bias: constant block -> single-buffered (no wasted VMEM)
                pl.BlockSpec((1, C_out_p), lambda i, k: (0, 0),
                             pipeline_mode=pl.Buffered(1)),
            ],
            out_specs=pl.BlockSpec((tm_eff, C_out_p), lambda i, k: (i, 0)),
            scratch_shapes=[pltpu.VMEM((tm_eff, C_out_p), jnp.float32)],
        ),
        compiler_params=pltpu.CompilerParams(
            dimension_semantics=("parallel", "arbitrary"),
            # 48 MiB: well under v7x's 64 MiB physical per-core VMEM (headroom
            # for Mosaic scratch), generous on v5e/v6e, and far above this
            # kernel's actual ~10 MiB footprint at Swin scale.
            vmem_limit_bytes=48 * 1024 * 1024,
        ),
    )(x2, w1_p, b1_p, w2_p, b2_p)

    return out2[:M, :C_out].reshape(B, N, C_out)


def _init_params(key, in_features, hidden_features, out_features, dtype=jnp.float32):
    """Deterministic synthetic init (roughly nn.Linear's uniform fan-in scheme)."""
    k1, k2, k3, k4 = jax.random.split(key, 4)
    bound1 = 1.0 / math.sqrt(in_features)
    bound2 = 1.0 / math.sqrt(hidden_features)
    # Stored as W[in, out] (transposed vs. PyTorch's [out, in]).
    w1 = jax.random.uniform(k1, (in_features, hidden_features), jnp.float32, -bound1, bound1)
    b1 = jax.random.uniform(k2, (hidden_features,), jnp.float32, -bound1, bound1)
    w2 = jax.random.uniform(k3, (hidden_features, out_features), jnp.float32, -bound2, bound2)
    b2 = jax.random.uniform(k4, (out_features,), jnp.float32, -bound2, bound2)
    return (w1.astype(dtype), b1.astype(dtype), w2.astype(dtype), b2.astype(dtype))


def _reference(x, w1, b1, w2, b2):
    x, w1, b1, w2, b2 = (a.astype(jnp.float32) for a in (x, w1, b1, w2, b2))
    h = x @ w1 + b1
    h = 0.5 * h * (1.0 + jax.lax.erf(h / math.sqrt(2.0)))
    return h @ w2 + b2


if __name__ == "__main__":
    k1, k2, k3, k4 = jax.random.split(jax.random.PRNGKey(0), 4)

    # Case 1: small, non-lane-aligned shapes (exercises channel + row padding), f32.
    B, N, C, Hd = 2, 64, 32, 64
    x = jax.random.normal(k1, (B, N, C), jnp.float32)
    w1, b1, w2, b2 = _init_params(k2, C, Hd, C, dtype=jnp.float32)
    out = jax.block_until_ready(mlp_pallas(x, w1, b1, w2, b2))
    ref = _reference(x, w1, b1, w2, b2)
    assert out.shape == (B, N, C)
    assert jnp.allclose(out, ref, atol=1e-4, rtol=1e-4), "f32 mismatch vs reference"

    # Case 2: lane-dense bf16 path with multiple row tiles AND multiple H slabs
    # (exercises the accumulator pipeline: grid = (2, 2) with th=128).
    B2, N2, C2, H2 = 2, 128, 128, 256
    xb = jax.random.normal(k3, (B2, N2, C2), jnp.float32).astype(jnp.bfloat16)
    w1b, b1b, w2b, b2b = _init_params(k4, C2, H2, C2, dtype=jnp.bfloat16)
    outb = jax.block_until_ready(mlp_pallas(xb, w1b, b1b, w2b, b2b, th=128))
    refb = _reference(xb, w1b, b1b, w2b, b2b)
    assert outb.shape == (B2, N2, C2)
    assert jnp.allclose(outb.astype(jnp.float32), refb, atol=3e-2, rtol=3e-2), \
        "bf16 mismatch vs reference"

    # Case 3: v5e-style bf16-operand path on f32 params (f32 accumulation kept).
    outc = jax.block_until_ready(mlp_pallas(x, w1, b1, w2, b2, bf16_operands=True))
    assert outc.shape == (B, N, C)
    assert jnp.allclose(outc, ref, atol=3e-2, rtol=3e-2), \
        "bf16-operand mismatch vs reference"

    print("KERNEL_OK")
</pallas_src>

<mosaic_0001>
module attributes {stable_mosaic.version = 11 : i64} {
  func.func @_mlp_kernel(%arg0: i32, %arg1: i32, %arg2: memref<128x128xf32, #tpu.memory_space<vmem>>, %arg3: memref<128x128xf32, #tpu.memory_space<vmem>>, %arg4: memref<1x128xf32, #tpu.memory_space<vmem>>, %arg5: memref<128x128xf32, #tpu.memory_space<vmem>>, %arg6: memref<1x128xf32, #tpu.memory_space<vmem>>, %arg7: memref<128x128xf32, #tpu.memory_space<vmem>>, %arg8: memref<128x128xf32, #tpu.memory_space<vmem>>) attributes {dimension_semantics = [#tpu.dimension_semantics<parallel>, #tpu.dimension_semantics<arbitrary>], iteration_bounds = array<i64: 1, 1>, scalar_prefetch = 0 : i64, scratch_operands = 1 : i64, tpu.core_type = #tpu.core_type<tc>, window_params = [{transform_indices = @transform_0, window_bounds = array<i64: 128, 128>}, {transform_indices = @transform_1, window_bounds = array<i64: 128, 128>}, {transform_indices = @transform_2, window_bounds = array<i64: 1, 128>}, {transform_indices = @transform_3, window_bounds = array<i64: 128, 128>}, {pipeline_mode = #tpu.pipeline_mode<synchronous>, transform_indices = @transform_4, window_bounds = array<i64: 1, 128>}, {transform_indices = @transform_5, window_bounds = array<i64: 128, 128>}]} {
    %c0_i32 = arith.constant 0 : i32
    %0 = arith.cmpi eq, %arg1, %c0_i32 : i32
    %1 = arith.extui %0 : i1 to i32
    %c0_i32_0 = arith.constant 0 : i32
    %2 = arith.cmpi ne, %1, %c0_i32_0 : i32
    scf.if %2 {
      %cst_18 = arith.constant 0.000000e+00 : f32
      %25 = vector.broadcast %cst_18 : f32 to vector<128x128xf32>
      %c0_19 = arith.constant 0 : index
      %c0_20 = arith.constant 0 : index
      %26 = vector.load %arg8[%c0_19, %c0_20] : memref<128x128xf32, #tpu.memory_space<vmem>>, vector<128x128xf32>
      tpu.vector_store %arg8[%c0_19, %c0_20], %25 {strides = array<i32>} : memref<128x128xf32, #tpu.memory_space<vmem>>, vector<128x128xf32>,
    } else {
    }
    %c0 = arith.constant 0 : index
    %c0_1 = arith.constant 0 : index
    %3 = vector.load %arg2[%c0, %c0_1] : memref<128x128xf32, #tpu.memory_space<vmem>>, vector<128x128xf32>
    %c0_2 = arith.constant 0 : index
    %c0_3 = arith.constant 0 : index
    %4 = vector.load %arg3[%c0_2, %c0_3] : memref<128x128xf32, #tpu.memory_space<vmem>>, vector<128x128xf32>
    %cst = arith.constant dense<0.000000e+00> : vector<128x128xf32>
    %5 = tpu.matmul %3, %4, %cst {dimension_numbers = #tpu.dot_dimension_numbers<[1], [0], [0], [1], [0, 0, 1, 1], [], []>} : vector<128x128xf32>, vector<128x128xf32>, vector<128x128xf32> -> vector<128x128xf32>
    %c0_4 = arith.constant 0 : index
    %c0_5 = arith.constant 0 : index
    %6 = vector.load %arg4[%c0_4, %c0_5] : memref<1x128xf32, #tpu.memory_space<vmem>>, vector<1x128xf32>
    %7 = vector.broadcast %6 : vector<1x128xf32> to vector<128x128xf32>
    %8 = arith.addf %5, %7 : vector<128x128xf32>
    %cst_6 = arith.constant 5.000000e-01 : f32
    %9 = vector.broadcast %cst_6 : f32 to vector<128x128xf32>
    %10 = arith.mulf %9, %8 : vector<128x128xf32>
    %cst_7 = arith.constant 0.707106769 : f32
    %11 = vector.broadcast %cst_7 : f32 to vector<128x128xf32>
    %12 = arith.mulf %8, %11 : vector<128x128xf32>
    %13 = math.erf %12 : vector<128x128xf32>
    %cst_8 = arith.constant 1.000000e+00 : f32
    %14 = vector.broadcast %cst_8 : f32 to vector<128x128xf32>
    %15 = arith.addf %14, %13 : vector<128x128xf32>
    %16 = arith.mulf %10, %15 : vector<128x128xf32>
    %c0_9 = arith.constant 0 : index
    %c0_10 = arith.constant 0 : index
    %17 = vector.load %arg8[%c0_9, %c0_10] : memref<128x128xf32, #tpu.memory_space<vmem>>, vector<128x128xf32>
    %c0_11 = arith.constant 0 : index
    %c0_12 = arith.constant 0 : index
    %18 = vector.load %arg5[%c0_11, %c0_12] : memref<128x128xf32, #tpu.memory_space<vmem>>, vector<128x128xf32>
    %cst_13 = arith.constant dense<0.000000e+00> : vector<128x128xf32>
    %19 = tpu.matmul %16, %18, %cst_13 {dimension_numbers = #tpu.dot_dimension_numbers<[1], [0], [0], [1], [0, 0, 1, 1], [], []>} : vector<128x128xf32>, vector<128x128xf32>, vector<128x128xf32> -> vector<128x128xf32>
    %20 = arith.addf %17, %19 : vector<128x128xf32>
    %c0_14 = arith.constant 0 : index
    %c0_15 = arith.constant 0 : index
    %21 = vector.load %arg8[%c0_14, %c0_15] : memref<128x128xf32, #tpu.memory_space<vmem>>, vector<128x128xf32>
    tpu.vector_store %arg8[%c0_14, %c0_15], %20 {strides = array<i32>} : memref<128x128xf32, #tpu.memory_space<vmem>>, vector<128x128xf32>,
    %c0_i32_16 = arith.constant 0 : i32
    %22 = arith.cmpi eq, %arg1, %c0_i32_16 : i32
    %23 = arith.extui %22 : i1 to i32
    %c0_i32_17 = arith.constant 0 : i32
    %24 = arith.cmpi ne, %23, %c0_i32_17 : i32
    scf.if %24 {
      %c0_18 = arith.constant 0 : index
      %c0_19 = arith.constant 0 : index
      %25 = vector.load %arg8[%c0_18, %c0_19] : memref<128x128xf32, #tpu.memory_space<vmem>>, vector<128x128xf32>
      %c0_20 = arith.constant 0 : index
      %c0_21 = arith.constant 0 : index
      %26 = vector.load %arg6[%c0_20, %c0_21] : memref<1x128xf32, #tpu.memory_space<vmem>>, vector<1x128xf32>
      %27 = vector.broadcast %26 : vector<1x128xf32> to vector<128x128xf32>
      %28 = arith.addf %25, %27 : vector<128x128xf32>
      %c0_22 = arith.constant 0 : index
      %c0_23 = arith.constant 0 : index
      %29 = vector.load %arg7[%c0_22, %c0_23] : memref<128x128xf32, #tpu.memory_space<vmem>>, vector<128x128xf32>
      tpu.vector_store %arg7[%c0_22, %c0_23], %28 {strides = array<i32>} : memref<128x128xf32, #tpu.memory_space<vmem>>, vector<128x128xf32>,
    } else {
    }
    return
  }
  func.func @transform_0(%arg0: i32, %arg1: i32) -> (i32, i32) {
    %c0_i32 = arith.constant 0 : i32
    %c0_i32_0 = arith.constant 0 : i32
    return %arg0, %c0_i32 : i32, i32
  }
  func.func @transform_1(%arg0: i32, %arg1: i32) -> (i32, i32) {
    %c0_i32 = arith.constant 0 : i32
    %c0_i32_0 = arith.constant 0 : i32
    return %c0_i32, %arg1 : i32, i32
  }
  func.func @transform_2(%arg0: i32, %arg1: i32) -> (i32, i32) {
    %c0_i32 = arith.constant 0 : i32
    %c0_i32_0 = arith.constant 0 : i32
    return %c0_i32, %arg1 : i32, i32
  }
  func.func @transform_3(%arg0: i32, %arg1: i32) -> (i32, i32) {
    %c0_i32 = arith.constant 0 : i32
    %c0_i32_0 = arith.constant 0 : i32
    return %arg1, %c0_i32 : i32, i32
  }
  func.func @transform_4(%arg0: i32, %arg1: i32) -> (i32, i32) {
    %c0_i32 = arith.constant 0 : i32
    %c0_i32_0 = arith.constant 0 : i32
    %c0_i32_1 = arith.constant 0 : i32
    return %c0_i32, %c0_i32_0 : i32, i32
  }
  func.func @transform_5(%arg0: i32, %arg1: i32) -> (i32, i32) {
    %c0_i32 = arith.constant 0 : i32
    %c0_i32_0 = arith.constant 0 : i32
    return %arg0, %c0_i32 : i32, i32
  }
}

</mosaic_0001>

<bundles_post_ra>
// kernel: mlp_pallas.1
= control target key start
LH: loop header
LB: loop body
LE: loop exit
PB: predicated region body
PF: predicated region fallthrough
CT: control target
= control target key end

     0   :  { %s1107_s1 = inlined_call_operand.vmem [shape: f32[128,128], index: 1, kind: input, shape index: {}]   ;;  %s1108_s0 = inlined_call_operand.vmem [shape: f32[128,128], index: 0, kind: input, shape index: {}]   ;;  %s1109_s3 = inlined_call_operand.vmem [shape: f32[128,128], index: 3, kind: input, shape index: {}]   ;;  %s1110_s2 = inlined_call_operand.vmem [shape: f32[1,128], index: 2, kind: input, shape index: {}]   ;;  %s1111_s4 = inlined_call_operand.vmem [shape: f32[1,128], index: 4, kind: input, shape index: {}]   ;;  %s1112_s5 = inlined_call_operand.vmem [shape: f32[128,128], index: 5, kind: output, shape index: {}]  }
   0x1   :  { %v56_v0 = vld [vmem:[%s1107_s1] sm:$0xff]  ;;  %v57_v1 = vld [vmem:[%s1107_s1 + $0x8] sm:$0xff]  ;;  %v58_v2 = vld [vmem:[%s1107_s1 + $0x10] sm:$0xff] }
   0x2   :  { %v753_v3 = vpack.c.bf16 %v57_v1, %v56_v0  ;;  %v59_v4 = vld [vmem:[%s1107_s1 + $0x18] sm:$0xff]  ;;  %v60_v6 = vld [vmem:[%s1107_s1 + $0x20] sm:$0xff]  ;;  %v61_v7 = vld [vmem:[%s1107_s1 + $0x28] sm:$0xff] }
   0x3   :  { %v757_v5 = vpack.c.bf16 %v59_v4, %v58_v2  ;;  %v761_v8 = vpack.c.bf16 %v61_v7, %v60_v6  ;;  %v40_v9 = vld [vmem:[%s1108_s0] sm:$0xff]  ;;  %v62_v10 = vld [vmem:[%s1107_s1 + $0x30] sm:$0xff]  ;;  %v63_v11 = vld [vmem:[%s1107_s1 + $0x38] sm:$0xff] }
   0x4   :  { %754 = vmatprep.subr.bf16.mxu0 %v753_v3  ;;  %673 = vmatprep.mubr.f32.mxu0 %v40_v9  ;;  %v765_v12 = vpack.c.bf16 %v63_v11, %v62_v10  ;;  %v64_v13 = vld [vmem:[%s1107_s1 + $0x40] sm:$0xff]  ;;  %v65_v14 = vld [vmem:[%s1107_s1 + $0x48] sm:$0xff]  ;;  %v322_v17 = vld [vmem:[%s1109_s3 + $0x10] sm:$0xff] }
   0x5   :  { %756 = vmatpush3.bf16.msra.mxu0 %v753_v3  ;;  %v320_v15 = vld [vmem:[%s1109_s3] sm:$0xff]  ;;  %v321_v16 = vld [vmem:[%s1109_s3 + $0x8] sm:$0xff]  ;;  %v323_v18 = vld [vmem:[%s1109_s3 + $0x18] sm:$0xff]  ;;  %v769_v21 = vpack.c.bf16 %v65_v14, %v64_v13 }
   0x6   :  { %758 = vmatprep.subr.bf16.mxu0 %v757_v5  ;;  %v785_v19 = vpack.c.bf16 %v321_v16, %v320_v15  ;;  %v789_v20 = vpack.c.bf16 %v323_v18, %v322_v17  ;;  %v324_v22 = vld [vmem:[%s1109_s3 + $0x20] sm:$0xff]  ;;  %v325_v23 = vld [vmem:[%s1109_s3 + $0x28] sm:$0xff]  ;;  %v66_v24 = vld [vmem:[%s1107_s1 + $0x50] sm:$0xff] }
   0x7   :  { %v67_v25 = vld [vmem:[%s1107_s1 + $0x58] sm:$0xff]  ;;  %v793_v26 = vpack.c.bf16 %v325_v23, %v324_v22  ;;  %v68_v28 = vld [vmem:[%s1107_s1 + $0x60] sm:$0xff]  ;;  %v69_v29 = vld [vmem:[%s1107_s1 + $0x68] sm:$0xff] }
   0x8   :  { %786 = vmatprep.subr.bf16.mxu1 %v785_v19  ;;  %v773_v27 = vpack.c.bf16 %v67_v25, %v66_v24  ;;  %v777_v30 = vpack.c.bf16 %v69_v29, %v68_v28  ;;  %v70_v31 = vld [vmem:[%s1107_s1 + $0x70] sm:$0xff]  ;;  %v71_v32 = vld [vmem:[%s1107_s1 + $0x78] sm:$0xff]  ;;  %v41_v34 = vld [vmem:[%s1108_s0 + $0x8] sm:$0xff] }
   0x9   :  { %760 = vmatpush3.bf16.msra.mxu0 %v757_v5  ;;  %788 = vmatpush3.bf16.msra.mxu1 %v785_v19  ;;  %v781_v33 = vpack.c.bf16 %v71_v32, %v70_v31  ;;  %v42_v35 = vld [vmem:[%s1108_s0 + $0x10] sm:$0xff]  ;;  %v43_v36 = vld [vmem:[%s1108_s0 + $0x18] sm:$0xff]  ;;  %v44_v37 = vld [vmem:[%s1108_s0 + $0x20] sm:$0xff] }
   0xa   :  { %762 = vmatprep.subr.bf16.mxu0 %v761_v8  ;;  %790 = vmatprep.subr.bf16.mxu1 %v789_v20  ;;  %v45_v38 = vld [vmem:[%s1108_s0 + $0x28] sm:$0xff]  ;;  %v46_v39 = vld [vmem:[%s1108_s0 + $0x30] sm:$0xff]  ;;  %v47_v40 = vld [vmem:[%s1108_s0 + $0x38] sm:$0xff] }
   0xb   :  { %v48_v41 = vld [vmem:[%s1108_s0 + $0x40] sm:$0xff]  ;;  %v49_v42 = vld [vmem:[%s1108_s0 + $0x48] sm:$0xff]  ;;  %v50_v43 = vld [vmem:[%s1108_s0 + $0x50] sm:$0xff] }
   0xc   :  { %v51_v44 = vld [vmem:[%s1108_s0 + $0x58] sm:$0xff]  ;;  %v52_v45 = vld [vmem:[%s1108_s0 + $0x60] sm:$0xff]  ;;  %v53_v46 = vld [vmem:[%s1108_s0 + $0x68] sm:$0xff] }
   0xd   :  { %764 = vmatpush3.bf16.msra.mxu0 %v761_v8  ;;  %792 = vmatpush3.bf16.msra.mxu1 %v789_v20  ;;  %v54_v47 = vld [vmem:[%s1108_s0 + $0x70] sm:$0xff]  ;;  %v55_v48 = vld [vmem:[%s1108_s0 + $0x78] sm:$0xff]  ;;  %v328_v52 = vld [vmem:[%s1109_s3 + $0x40] sm:$0xff] }
   0xe   :  { %766 = vmatprep.subr.bf16.mxu0 %v765_v12  ;;  %794 = vmatprep.subr.bf16.mxu1 %v793_v26  ;;  %v326_v49 = vld [vmem:[%s1109_s3 + $0x30] sm:$0xff]  ;;  %v327_v50 = vld [vmem:[%s1109_s3 + $0x38] sm:$0xff]  ;;  %v329_v53 = vld [vmem:[%s1109_s3 + $0x48] sm:$0xff] }
   0xf   :  { %v797_v51 = vpack.c.bf16 %v327_v50, %v326_v49  ;;  %v801_v54 = vpack.c.bf16 %v329_v53, %v328_v52  ;;  %v330_v55 = vld [vmem:[%s1109_s3 + $0x50] sm:$0xff]  ;;  %v331_v56 = vld [vmem:[%s1109_s3 + $0x58] sm:$0xff]  ;;  %v332_v58 = vld [vmem:[%s1109_s3 + $0x60] sm:$0xff] }
  0x10   :  { %v805_v57 = vpack.c.bf16 %v331_v56, %v330_v55  ;;  %v333_v59 = vld [vmem:[%s1109_s3 + $0x68] sm:$0xff]  ;;  %v334_v61 = vld [vmem:[%s1109_s3 + $0x70] sm:$0xff]  ;;  %v335_v62 = vld [vmem:[%s1109_s3 + $0x78] sm:$0xff] }
  0x11   :  { %768 = vmatpush3.bf16.msra.mxu0 %v765_v12  ;;  %796 = vmatpush3.bf16.msra.mxu1 %v793_v26  ;;  %v809_v60 = vpack.c.bf16 %v333_v59, %v332_v58  ;;  %v813_v63 = vpack.c.bf16 %v335_v62, %v334_v61  ;;  %v1026_v0 = vld [vmem:[%s1110_s2] ss:$0 sm:$0xff] }
  0x12   :  { %770 = vmatprep.subr.bf16.mxu0 %v769_v21  ;;  %798 = vmatprep.subr.bf16.mxu1 %v797_v51 }
  0x15   :  { %772 = vmatpush3.bf16.msra.mxu0 %v769_v21  ;;  %800 = vmatpush3.bf16.msra.mxu1 %v797_v51 }
  0x16   :  { %774 = vmatprep.subr.bf16.mxu0 %v773_v27  ;;  %802 = vmatprep.subr.bf16.mxu1 %v801_v54 }
  0x19   :  { %776 = vmatpush3.bf16.msra.mxu0 %v773_v27  ;;  %804 = vmatpush3.bf16.msra.mxu1 %v801_v54 }
  0x1a   :  { %778 = vmatprep.subr.bf16.mxu0 %v777_v30  ;;  %806 = vmatprep.subr.bf16.mxu1 %v805_v57 }
  0x1d   :  { %780 = vmatpush3.bf16.msra.mxu0 %v777_v30  ;;  %808 = vmatpush3.bf16.msra.mxu1 %v805_v57 }
  0x1e   :  { %782 = vmatprep.subr.bf16.mxu0 %v781_v33  ;;  %810 = vmatprep.subr.bf16.mxu1 %v809_v60 }
  0x21   :  { %784 = vmatpush3.bf16.msra.mxu0 %v781_v33  ;;  %812 = vmatpush3.bf16.msra.mxu1 %v809_v60 }
  0x22   :  { %814 = vmatprep.subr.bf16.mxu1 %v813_v63 }
  0x24   :  { %674 = vmatmul.mubr.f32.vlgmr.msra.gmra.mrb[0].mxu0 %v41_v34 }
  0x25   :  { %676 = vmatprep.mubr.f32.mxu0 %v42_v35  ;;  %816 = vmatpush3.bf16.msra.mxu1 %v813_v63 }
  0x28   :  { %677 = vmatmul.mubr.f32.gmra.mrb[2].mxu0 %v43_v36 }
  0x29   :  { %679 = vmatprep.mubr.f32.mxu0 %v44_v37 }
  0x2c   :  { %680 = vmatmul.mubr.f32.gmra.mrb[4].mxu0 %v45_v38 }
  0x2d   :  { %682 = vmatprep.mubr.f32.mxu0 %v46_v39 }
  0x30   :  { %683 = vmatmul.mubr.f32.gmra.mrb[6].mxu0 %v47_v40 }
  0x31   :  { %685 = vmatprep.mubr.f32.mxu0 %v48_v41 }
  0x34   :  { %686 = vmatmul.mubr.f32.gmra.mrb[8].mxu0 %v49_v42 }
  0x35   :  { %688 = vmatprep.mubr.f32.mxu0 %v50_v43 }
  0x38   :  { %689 = vmatmul.mubr.f32.gmra.mrb[10].mxu0 %v51_v44 }
  0x39   :  { %691 = vmatprep.mubr.f32.mxu0 %v52_v45 }
  0x3c   :  { %692 = vmatmul.mubr.f32.gmra.mrb[12].mxu0 %v53_v46 }
  0x3d   :  { %694 = vmatprep.mubr.f32.mxu0 %v54_v47 }
  0x40   :  { %695 = vmatmul.mubr.f32.gmra.mrb[14].mxu0 %v55_v48 }
  0xf7   :  { %v675_v1 = vpop.f32.mrb[0].mxu0 }
  0xf8   :  { %v151_v2 = vadd.f32 %v675_v1, %v1026_v0  ;;  %v145_v3 = vpop.f32.mrb[1].mxu0 }
  0xf9   :  { %v146_v4 = vadd.f32 %v1026_v0, %v145_v3 }
  0xfa   :  { %v241_v5 = vmul.f32 0.70710677, %v151_v2  ;;  %v225_v33 = vmul.f32 0.5, %v151_v2 }
  0xfb   :  { %v240_v6 = vmul.f32 0.70710677, %v146_v4  ;;  %v678_v7 = vpop.f32.mrb[2].mxu0  ;;  %v224_v31 = vmul.f32 0.5, %v146_v4 }
  0xfc   :  { %817 = verf.f32 %v241_v5  ;;  %v161_v8 = vadd.f32 %v678_v7, %v1026_v0  ;;  %v155_v9 = vpop.f32.mrb[3].mxu0 }
  0xfd   :  { %819 = verf.f32 %v240_v6  ;;  %v156_v10 = vadd.f32 %v1026_v0, %v155_v9 }
  0xfe   :  { %v243_v11 = vmul.f32 0.70710677, %v161_v8  ;;  %v227_v47 = vmul.f32 0.5, %v161_v8 }
  0xff   :  { %v242_v12 = vmul.f32 0.70710677, %v156_v10  ;;  %v681_v13 = vpop.f32.mrb[4].mxu0  ;;  %v226_v43 = vmul.f32 0.5, %v156_v10 }
 0x100   :  { %821 = verf.f32 %v243_v11  ;;  %v171_v14 = vadd.f32 %v681_v13, %v1026_v0  ;;  %v165_v15 = vpop.f32.mrb[5].mxu0 }
 0x101   :  { %823 = verf.f32 %v242_v12  ;;  %v166_v16 = vadd.f32 %v1026_v0, %v165_v15 }
 0x102   :  { %v245_v17 = vmul.f32 0.70710677, %v171_v14  ;;  %v229_v61 = vmul.f32 0.5, %v171_v14 }
 0x103   :  { %v244_v18 = vmul.f32 0.70710677, %v166_v16  ;;  %v684_v19 = vpop.f32.mrb[6].mxu0  ;;  %v228_v57 = vmul.f32 0.5, %v166_v16 }
 0x104   :  { %825 = verf.f32 %v245_v17  ;;  %v1035_v20 = vadd.f32 %v684_v19, %v1026_v0  ;;  %v175_v21 = vpop.f32.mrb[7].mxu0 }
 0x105   :  { %827 = verf.f32 %v244_v18  ;;  %v176_v22 = vadd.f32 %v1026_v0, %v175_v21 }
 0x106   :  { %v818_v23 = vpop.eup %817  ;;  %v247_v24 = vmul.f32 0.70710677, %v1035_v20  ;;  %v231_v12 = vmul.f32 0.5, %v1035_v20 }
 0x107   :  { %v820_v25 = vpop.eup %819  ;;  %v273_v26 = vadd.f32 1.0, %v818_v23  ;;  %v246_v27 = vmul.f32 0.70710677, %v176_v22  ;;  %v687_v28 = vpop.f32.mrb[8].mxu0  ;;  %v230_v8 = vmul.f32 0.5, %v176_v22 }
 0x108   :  { %829 = verf.f32 %v247_v24  ;;  %v1040_v29 = vadd.f32 %v687_v28, %v1026_v0  ;;  %v185_v30 = vpop.f32.mrb[9].mxu0  ;;  %v272_v32 = vadd.f32 1.0, %v820_v25 }
 0x109   :  { %831 = verf.f32 %v246_v27  ;;  %v186_v34 = vadd.f32 %v1026_v0, %v185_v30  ;;  %v289_v42 = vmul.f32 %v273_v26, %v225_v33 }
 0x10a   :  { %v822_v35 = vpop.eup %821  ;;  %v249_v36 = vmul.f32 0.70710677, %v1040_v29  ;;  %v288_v37 = vmul.f32 %v272_v32, %v224_v31  ;;  %v233_v24 = vmul.f32 0.5, %v1040_v29 }
 0x10b   :  { %v824_v38 = vpop.eup %823  ;;  %v275_v39 = vadd.f32 1.0, %v822_v35  ;;  %v248_v40 = vmul.f32 0.70710677, %v186_v34  ;;  %v690_v41 = vpop.f32.mrb[10].mxu0  ;;  %v232_v22 = vmul.f32 0.5, %v186_v34 }
 0x10c   :  { %v274_v44 = vadd.f32 1.0, %v824_v38  ;;  %833 = verf.f32 %v249_v36  ;;  %v1045_v45 = vadd.f32 %v690_v41, %v1026_v0  ;;  %v195_v46 = vpop.f32.mrb[11].mxu0  ;;  %729 = vmatprep.mubr.f32.mxu1 %v288_v37 }
 0x10d   :  { %835 = verf.f32 %v248_v40  ;;  %v196_v48 = vadd.f32 %v1026_v0, %v195_v46  ;;  %730 = vmatmul.mubr.f32.vlgmr.msra.gmra.mrb[0].mxu1 %v289_v42  ;;  %v291_v56 = vmul.f32 %v275_v39, %v227_v47 }
 0x10e   :  { %v826_v49 = vpop.eup %825  ;;  %v251_v50 = vmul.f32 0.70710677, %v1045_v45  ;;  %v290_v51 = vmul.f32 %v274_v44, %v226_v43  ;;  %v235_v31 = vmul.f32 0.5, %v1045_v45 }
 0x10f   :  { %v828_v52 = vpop.eup %827  ;;  %v277_v53 = vadd.f32 1.0, %v826_v49  ;;  %v250_v54 = vmul.f32 0.70710677, %v196_v48  ;;  %v693_v55 = vpop.f32.mrb[12].mxu0  ;;  %v234_v28 = vmul.f32 0.5, %v196_v48 }
 0x110   :  { %v276_v58 = vadd.f32 1.0, %v828_v52  ;;  %837 = verf.f32 %v251_v50  ;;  %v211_v59 = vadd.f32 %v693_v55, %v1026_v0  ;;  %v205_v60 = vpop.f32.mrb[13].mxu0  ;;  %732 = vmatprep.mubr.f32.mxu1 %v290_v51  ;;  %v576_v49 = vld [vmem:[%s1111_s4] ss:$0 sm:$0xff] }
 0x111   :  { %839 = verf.f32 %v250_v54  ;;  %v206_v62 = vadd.f32 %v1026_v0, %v205_v60  ;;  %733 = vmatmul.mubr.f32.gmra.mrb[2].mxu1 %v291_v56  ;;  %v293_v7 = vmul.f32 %v277_v53, %v229_v61 }
 0x112   :  { %v830_v63 = vpop.eup %829  ;;  %v253_v1 = vmul.f32 0.70710677, %v211_v59  ;;  %v292_v2 = vmul.f32 %v276_v58, %v228_v57  ;;  %v237_v38 = vmul.f32 0.5, %v211_v59 }
 0x113   :  { %v832_v3 = vpop.eup %831  ;;  %v279_v4 = vadd.f32 1.0, %v830_v63  ;;  %v252_v5 = vmul.f32 0.70710677, %v206_v62  ;;  %v696_v6 = vpop.f32.mrb[14].mxu0  ;;  %v236_v37 = vmul.f32 0.5, %v206_v62 }
 0x114   :  { %v278_v9 = vadd.f32 1.0, %v832_v3  ;;  %841 = verf.f32 %v253_v1  ;;  %v221_v10 = vadd.f32 %v696_v6, %v1026_v0  ;;  %v215_v11 = vpop.f32.mrb[15].mxu0  ;;  %735 = vmatprep.mubr.f32.mxu1 %v292_v2 }
 0x115   :  { %843 = verf.f32 %v252_v5  ;;  %v216_v13 = vadd.f32 %v1026_v0, %v215_v11  ;;  %736 = vmatmul.mubr.f32.gmra.mrb[4].mxu1 %v293_v7  ;;  %v295_v21 = vmul.f32 %v279_v4, %v231_v12 }
 0x116   :  { %v834_v14 = vpop.eup %833  ;;  %v255_v15 = vmul.f32 0.70710677, %v221_v10  ;;  %v294_v16 = vmul.f32 %v278_v9, %v230_v8  ;;  %v239_v45 = vmul.f32 0.5, %v221_v10 }
 0x117   :  { %v836_v17 = vpop.eup %835  ;;  %v281_v18 = vadd.f32 1.0, %v834_v14  ;;  %v254_v19 = vmul.f32 0.70710677, %v216_v13  ;;  %v238_v44 = vmul.f32 0.5, %v216_v13 }
 0x118   :  { %v280_v23 = vadd.f32 1.0, %v836_v17  ;;  %845 = verf.f32 %v255_v15  ;;  %738 = vmatprep.mubr.f32.mxu1 %v294_v16 }
 0x119   :  { %847 = verf.f32 %v254_v19  ;;  %739 = vmatmul.mubr.f32.gmra.mrb[6].mxu1 %v295_v21  ;;  %v297_v27 = vmul.f32 %v281_v18, %v233_v24 }
 0x11a   :  { %v838_v20 = vpop.eup %837  ;;  %v296_v25 = vmul.f32 %v280_v23, %v232_v22 }
 0x11b   :  { %v840_v26 = vpop.eup %839  ;;  %v283_v0 = vadd.f32 1.0, %v838_v20 }
 0x11c   :  { %v282_v30 = vadd.f32 1.0, %v840_v26  ;;  %741 = vmatprep.mubr.f32.mxu1 %v296_v25 }
 0x11d   :  { %742 = vmatmul.mubr.f32.gmra.mrb[8].mxu1 %v297_v27  ;;  %v299_v36 = vmul.f32 %v283_v0, %v235_v31 }
 0x11e   :  { %v842_v32 = vpop.eup %841  ;;  %v298_v33 = vmul.f32 %v282_v30, %v234_v28 }
 0x11f   :  { %v844_v34 = vpop.eup %843  ;;  %v285_v35 = vadd.f32 1.0, %v842_v32 }
 0x120   :  { %v284_v29 = vadd.f32 1.0, %v844_v34  ;;  %744 = vmatprep.mubr.f32.mxu1 %v298_v33 }
 0x121   :  { %745 = vmatmul.mubr.f32.gmra.mrb[10].mxu1 %v299_v36  ;;  %v301_v43 = vmul.f32 %v285_v35, %v237_v38 }
 0x122   :  { %v846_v39 = vpop.eup %845  ;;  %v300_v40 = vmul.f32 %v284_v29, %v236_v37 }
 0x123   :  { %v848_v41 = vpop.eup %847  ;;  %v287_v42 = vadd.f32 1.0, %v846_v39 }
 0x124   :  { %v286_v46 = vadd.f32 1.0, %v848_v41  ;;  %747 = vmatprep.mubr.f32.mxu1 %v300_v40 }
 0x125   :  { %748 = vmatmul.mubr.f32.gmra.mrb[12].mxu1 %v301_v43  ;;  %v303_v48 = vmul.f32 %v287_v42, %v239_v45 }
 0x126   :  { %v302_v47 = vmul.f32 %v286_v46, %v238_v44 }
 0x128   :  { %750 = vmatprep.mubr.f32.mxu1 %v302_v47 }
 0x129   :  { %751 = vmatmul.mubr.f32.gmra.mrb[14].mxu1 %v303_v48 }
 0x1e0   :  { %v731_v50 = vpop.f32.mrb[0].mxu1 }
 0x1e1   :  { %v540_v51 = vadd.f32 %v731_v50, %v576_v49  ;;  %v402_v52 = vpop.f32.mrb[1].mxu1 }
 0x1e2   :  { %v539_v53 = vadd.f32 %v576_v49, %v402_v52 }
 0x1e3   :  { %556 = vst [vmem:[%s1112_s5 + $0x8] sm:$0xff] %v540_v51 }
 0x1e4   :  { %555 = vst [vmem:[%s1112_s5] sm:$0xff] %v539_v53  ;;  %v734_v54 = vpop.f32.mrb[2].mxu1 }
 0x1e5   :  { %v542_v55 = vadd.f32 %v734_v54, %v576_v49  ;;  %v412_v56 = vpop.f32.mrb[3].mxu1 }
 0x1e6   :  { %v541_v57 = vadd.f32 %v576_v49, %v412_v56 }
 0x1e7   :  { %558 = vst [vmem:[%s1112_s5 + $0x18] sm:$0xff] %v542_v55 }
 0x1e8   :  { %557 = vst [vmem:[%s1112_s5 + $0x10] sm:$0xff] %v541_v57  ;;  %v737_v58 = vpop.f32.mrb[4].mxu1 }
 0x1e9   :  { %v544_v59 = vadd.f32 %v737_v58, %v576_v49  ;;  %v422_v60 = vpop.f32.mrb[5].mxu1 }
 0x1ea   :  { %v543_v61 = vadd.f32 %v576_v49, %v422_v60 }
 0x1eb   :  { %560 = vst [vmem:[%s1112_s5 + $0x28] sm:$0xff] %v544_v59 }
 0x1ec   :  { %559 = vst [vmem:[%s1112_s5 + $0x20] sm:$0xff] %v543_v61  ;;  %v740_v62 = vpop.f32.mrb[6].mxu1 }
 0x1ed   :  { %v546_v63 = vadd.f32 %v740_v62, %v576_v49  ;;  %v432_v1 = vpop.f32.mrb[7].mxu1 }
 0x1ee   :  { %v545_v2 = vadd.f32 %v576_v49, %v432_v1 }
 0x1ef   :  { %562 = vst [vmem:[%s1112_s5 + $0x38] sm:$0xff] %v546_v63 }
 0x1f0   :  { %561 = vst [vmem:[%s1112_s5 + $0x30] sm:$0xff] %v545_v2  ;;  %v743_v3 = vpop.f32.mrb[8].mxu1 }
 0x1f1   :  { %v548_v4 = vadd.f32 %v743_v3, %v576_v49  ;;  %v442_v5 = vpop.f32.mrb[9].mxu1 }
 0x1f2   :  { %v547_v6 = vadd.f32 %v576_v49, %v442_v5 }
 0x1f3   :  { %564 = vst [vmem:[%s1112_s5 + $0x48] sm:$0xff] %v548_v4 }
 0x1f4   :  { %563 = vst [vmem:[%s1112_s5 + $0x40] sm:$0xff] %v547_v6  ;;  %v746_v7 = vpop.f32.mrb[10].mxu1 }
 0x1f5   :  { %v550_v8 = vadd.f32 %v746_v7, %v576_v49  ;;  %v452_v9 = vpop.f32.mrb[11].mxu1 }
 0x1f6   :  { %v549_v10 = vadd.f32 %v576_v49, %v452_v9 }
 0x1f7   :  { %566 = vst [vmem:[%s1112_s5 + $0x58] sm:$0xff] %v550_v8 }
 0x1f8   :  { %565 = vst [vmem:[%s1112_s5 + $0x50] sm:$0xff] %v549_v10  ;;  %v749_v11 = vpop.f32.mrb[12].mxu1 }
 0x1f9   :  { %v552_v12 = vadd.f32 %v749_v11, %v576_v49  ;;  %v462_v13 = vpop.f32.mrb[13].mxu1 }
 0x1fa   :  { %v551_v14 = vadd.f32 %v576_v49, %v462_v13 }
 0x1fb   :  { %568 = vst [vmem:[%s1112_s5 + $0x68] sm:$0xff] %v552_v12 }
 0x1fc   :  { %567 = vst [vmem:[%s1112_s5 + $0x60] sm:$0xff] %v551_v14  ;;  %v752_v15 = vpop.f32.mrb[14].mxu1 }
 0x1fd   :  { %v554_v16 = vadd.f32 %v752_v15, %v576_v49  ;;  %v472_v17 = vpop.f32.mrb[15].mxu1 }
 0x1fe   :  { %v553_v18 = vadd.f32 %v576_v49, %v472_v17 }
 0x1ff   :  { %570 = vst [vmem:[%s1112_s5 + $0x78] sm:$0xff] %v554_v16 }
 0x200   :  { %569 = vst [vmem:[%s1112_s5 + $0x70] sm:$0xff] %v553_v18 }

</bundles_post_ra>
